<compile_context>
chip_gen: v7x
topology: tpu7x:2x2x1
jax: 0.10.0
libtpu: 0.0.40
codegen_flags: <defaults>
</compile_context>

<pallas_src>
import functools
import math

import jax
import jax.numpy as jnp
from jax.experimental import pallas as pl
from jax.experimental.pallas import tpu as pltpu


def _wo_proj_kernel(x_ref, w_ref, b_ref, o_ref):
    # x_ref: (1, ts, H*Hd)   w_ref: (H*Hd, E)   b_ref: (1, E)   o_ref: (1, ts, E)
    # Single lane-dense MXU matmul (K = H*Hd, N = E) with f32 accumulation + bias.
    o_ref[0] = (
        jnp.dot(x_ref[0], w_ref[...], preferred_element_type=jnp.float32)
        + b_ref[...]
    ).astype(o_ref.dtype)


def _pick_seq_tile(S, max_tile=512):
    """Largest sequence tile <= max_tile that divides S and respects the (8,128)
    sublane rule (multiple of 8, or the full axis)."""
    if S <= max_tile:
        return S
    for ts in range(max_tile, 7, -8):
        if S % ts == 0:
            return ts
    return S


def mha_attention(heads, wo_weight_t, wo_bias):
    """Forward of MHAttetion.

    heads:       sequence of H arrays, each (B, S, Hd), float32.
    wo_weight_t: (H*Hd, E) — the PyTorch Linear weight stored transposed so the
                 kernel consumes it without an in-kernel transpose.
    wo_bias:     (E,)
    """
    # torch.cat(heads, dim=-1): fold the head axis onto the lane axis.
    x = jnp.concatenate(list(heads), axis=-1)            # (B, S, H*Hd)
    B, S, D = x.shape
    E = wo_weight_t.shape[1]
    assert wo_weight_t.shape[0] == D

    ts = _pick_seq_tile(S)
    grid = (B, S // ts)

    x_spec = pl.BlockSpec((1, ts, D), lambda b, s: (b, s, 0))
    w_spec = pl.BlockSpec((D, E), lambda b, s: (0, 0))    # resident in VMEM
    b_spec = pl.BlockSpec((1, E), lambda b, s: (0, 0))    # resident in VMEM
    out_spec = pl.BlockSpec((1, ts, E), lambda b, s: (b, s, 0))

    return pl.pallas_call(
        _wo_proj_kernel,
        out_shape=jax.ShapeDtypeStruct((B, S, E), jnp.float32),
        grid_spec=pltpu.PrefetchScalarGridSpec(
            num_scalar_prefetch=0,
            grid=grid,
            in_specs=[x_spec, w_spec, b_spec],
            out_specs=out_spec,
        ),
        compiler_params=pltpu.CompilerParams(
            dimension_semantics=("parallel", "parallel")),
    )(x, wo_weight_t, wo_bias.reshape(1, E))


def init_params(key, emb_size, nrof_heads, d_hidden):
    """Mirrors MHAttetion.__init__: WO = Linear(H*Hd, E) with
    weight ~ N(0, sqrt(2/(E + 4E))) and zero bias.  Weight stored transposed
    as (H*Hd, E)."""
    D = nrof_heads * d_hidden
    std = math.sqrt(2.0 / (emb_size + 4 * emb_size))
    wo_weight_t = std * jax.random.normal(key, (D, emb_size), jnp.float32)
    wo_bias = jnp.zeros((emb_size,), jnp.float32)
    return wo_weight_t, wo_bias


def reference(heads, wo_weight_t, wo_bias):
    """Pure-JAX reference matching the PyTorch forward."""
    x = jnp.concatenate(list(heads), axis=-1)
    return x @ wo_weight_t + wo_bias


if __name__ == "__main__":
    # emb_size=32, nrof_heads=4, d_hidden=16; heads are (B, S, Hd).
    B, S, E, H, Hd = 2, 8, 32, 4, 16

    key = jax.random.PRNGKey(0)
    kh, kw = jax.random.split(key)
    head_keys = jax.random.split(kh, H)
    heads = [jax.random.normal(k, (B, S, Hd), jnp.float32) for k in head_keys]
    wo_weight_t, wo_bias = init_params(kw, E, H, Hd)

    out = mha_attention(heads, wo_weight_t, wo_bias)
    out = jax.block_until_ready(out)

    ref = reference(heads, wo_weight_t, wo_bias)
    assert out.shape == (B, S, E)
    assert jnp.allclose(out, ref, rtol=2e-3, atol=2e-3), "mismatch vs reference"

    print("KERNEL_OK")
</pallas_src>

<mosaic_0001>
module attributes {stable_mosaic.version = 11 : i64} {
  func.func @_wo_proj_kernel(%arg0: i32, %arg1: i32, %arg2: memref<1x8x64xf32, #tpu.memory_space<vmem>>, %arg3: memref<64x32xf32, #tpu.memory_space<vmem>>, %arg4: memref<1x32xf32, #tpu.memory_space<vmem>>, %arg5: memref<1x8x32xf32, #tpu.memory_space<vmem>>) attributes {dimension_semantics = [#tpu.dimension_semantics<parallel>, #tpu.dimension_semantics<parallel>], iteration_bounds = array<i64: 2, 1>, scalar_prefetch = 0 : i64, scratch_operands = 0 : i64, tpu.core_type = #tpu.core_type<tc>, window_params = [{transform_indices = @transform_0, window_bounds = array<i64: 1, 8, 64>}, {pipeline_mode = #tpu.pipeline_mode<synchronous>, transform_indices = @transform_1, window_bounds = array<i64: 64, 32>}, {pipeline_mode = #tpu.pipeline_mode<synchronous>, transform_indices = @transform_2, window_bounds = array<i64: 1, 32>}, {transform_indices = @transform_3, window_bounds = array<i64: 1, 8, 32>}]} {
    %c0 = arith.constant 0 : index
    %c0_0 = arith.constant 0 : index
    %c0_1 = arith.constant 0 : index
    %0 = vector.load %arg2[%c0, %c0_0, %c0_1] : memref<1x8x64xf32, #tpu.memory_space<vmem>>, vector<1x8x64xf32>
    %1 = vector.shape_cast %0 : vector<1x8x64xf32> to vector<8x64xf32>
    %c0_2 = arith.constant 0 : index
    %c0_3 = arith.constant 0 : index
    %2 = vector.load %arg3[%c0_2, %c0_3] : memref<64x32xf32, #tpu.memory_space<vmem>>, vector<64x32xf32>
    %cst = arith.constant dense<0.000000e+00> : vector<8x32xf32>
    %3 = tpu.matmul %1, %2, %cst {dimension_numbers = #tpu.dot_dimension_numbers<[1], [0], [0], [1], [0, 0, 1, 1], [], []>} : vector<8x64xf32>, vector<64x32xf32>, vector<8x32xf32> -> vector<8x32xf32>
    %c0_4 = arith.constant 0 : index
    %c0_5 = arith.constant 0 : index
    %4 = vector.load %arg4[%c0_4, %c0_5] : memref<1x32xf32, #tpu.memory_space<vmem>>, vector<1x32xf32>
    %5 = vector.broadcast %4 : vector<1x32xf32> to vector<8x32xf32>
    %6 = arith.addf %3, %5 : vector<8x32xf32>
    %c0_6 = arith.constant 0 : index
    %c0_7 = arith.constant 0 : index
    %c0_8 = arith.constant 0 : index
    %7 = vector.load %arg5[%c0_6, %c0_7, %c0_8] : memref<1x8x32xf32, #tpu.memory_space<vmem>>, vector<1x8x32xf32>
    %8 = vector.shape_cast %7 : vector<1x8x32xf32> to vector<8x32xf32>
    %9 = vector.shape_cast %6 : vector<8x32xf32> to vector<1x8x32xf32>
    tpu.vector_store %arg5[%c0_6, %c0_7, %c0_8], %9 {strides = array<i32>} : memref<1x8x32xf32, #tpu.memory_space<vmem>>, vector<1x8x32xf32>,
    return
  }
  func.func @transform_0(%arg0: i32, %arg1: i32) -> (i32, i32, i32) {
    %c0_i32 = arith.constant 0 : i32
    %c0_i32_0 = arith.constant 0 : i32
    return %arg0, %arg1, %c0_i32 : i32, i32, i32
  }
  func.func @transform_1(%arg0: i32, %arg1: i32) -> (i32, i32) {
    %c0_i32 = arith.constant 0 : i32
    %c0_i32_0 = arith.constant 0 : i32
    %c0_i32_1 = arith.constant 0 : i32
    return %c0_i32, %c0_i32_0 : i32, i32
  }
  func.func @transform_2(%arg0: i32, %arg1: i32) -> (i32, i32) {
    %c0_i32 = arith.constant 0 : i32
    %c0_i32_0 = arith.constant 0 : i32
    %c0_i32_1 = arith.constant 0 : i32
    return %c0_i32, %c0_i32_0 : i32, i32
  }
  func.func @transform_3(%arg0: i32, %arg1: i32) -> (i32, i32, i32) {
    %c0_i32 = arith.constant 0 : i32
    %c0_i32_0 = arith.constant 0 : i32
    return %arg0, %arg1, %c0_i32 : i32, i32, i32
  }
}

</mosaic_0001>

<bundles_post_ra>
// kernel: tpu_custom_call.1
= control target key start
LH: loop header
LB: loop body
LE: loop exit
PB: predicated region body
PF: predicated region fallthrough
CT: control target
= control target key end

     0   :  { %8 = vsyncpa [#allocation3], 0  ;;  %s723_s0 = inlined_call_operand.vmem [shape: f32[2,8,64], index: 0, kind: input, shape index: {}]   ;;  %s724_s1 = inlined_call_operand.vmem [shape: f32[64,32], index: 1, kind: input, shape index: {}]   ;;  %s725_s2 = inlined_call_operand.vmem [shape: f32[1,32], index: 2, kind: input, shape index: {}]   ;;  %s726_s3 = inlined_call_operand.hbm [shape: f32[2,8,32], index: 3, kind: output, shape index: {}]  }
   0x1   :  { %10 = vsyncpa [#allocation3 + $0x1], 0  ;;  %s584_s12 = smov 0   ;;  %s586_s13 = smov 0  }
   0x2   :  { %s588_s14 = smov 0   ;;  %s590_s15 = smov 0  }
   0x3   :  { %s592_s16 = smov 0   ;;  %s594_s17 = smov 0  }
   0x4 LB: > { %s369_s18 = sadd.s32 4294967295, %s558_s17   ;;  %s370_s19 = sadd.s32 4294967294, %s558_s17   ;;  %s558_s17 = sphi %s594_s17, %s16_s17   ;;  %s554_s16 = sphi %s592_s16, %s733_s16   ;;  %s550_s15 = sphi %s590_s15, %s732_s15   ;;  %s546_s14 = sphi %s588_s14, %s731_s14   ;;  %s542_s13 = sphi %s586_s13, %s730_s13   ;;  %s538_s12 = sphi %s584_s12, %s729_s12  }
   0x5   : > { %s28_s20 = sadd.s32 1, %s554_s16  ;;  %s107_s21 = sadd.s32 1, %s546_s14 }
   0x6   : > { %p30_p0 = scmp.ge.s32.totalorder %s28_s20, 2  ;;  %p117_p1 = scmp.ne.s32.totalorder %s546_s14, %s542_s13 }
   0x7   : > { %p118_p2 = scmp.eq.s32.totalorder %s369_s18, 1  ;;  %p123_p3 = scmp.ne.s32.totalorder %s542_s13, %s538_s12 }
   0x8   : > { %s735_s20 = smov (%p30_p0, %s28_s20), 0  ;;  %p124_p5 = scmp.eq.s32.totalorder %s370_s19, 1 }
   0x9   : > { %p624_p4 = por %p118_p2, %p117_p1  ;;  %s102_s23 = ssub.s32 %s554_s16, %s735_s20 }
   0xa   : > { %p373_p6 = scmp.ge.s32.totalorder %s558_s17, 1  ;;  %p105_p7 = scmp.eq.s32.totalorder %s102_s23, 0 }
   0xb   : > { %p631_p8 = por %p124_p5, %p123_p3  ;;  %p158_p9 = scmp.lt.s32.totalorder %s558_s17, 3 }
   0xc   : > { %s637_s25 = scalar_select %p105_p7, %s546_s14, %s107_s21  }
   0xd   : > { %p159_p10 = pnand %p373_p6, %p158_p9 }
   0xe   : > { %v192_v0 = vld [vmem:[%s724_s1] sm:$0xff] (!%p159_p10)  ;;  %v193_v1 = vld [vmem:[%s724_s1 + $0x8] sm:$0xff] (!%p159_p10)  ;;  %v194_v2 = vld [vmem:[%s724_s1 + $0x10] sm:$0xff] (!%p159_p10)  ;;  %v560_v3 = vmov (!%p159_p10), 0.0|0.0   ;;  %vm561_vm0 = vmmov (!%p159_p10), 0   ;;  %v562_v6 = vmov (!%p159_p10), 0.0  }
   0xf   : > { %162 = sbr.rel (%p159_p10) target bundleno = 260 (0x104), region = 32  ;;  %410 = vmatprep.subr.bf16.mxu0 (!%p159_p10), %v560_v3  ;;  %v411_v4 = vpack.c.bf16 (!%p159_p10), %v193_v1, %v192_v0  ;;  %v195_v5 = vld [vmem:[%s724_s1 + $0x18] sm:$0xff] (!%p159_p10)  ;;  %407 = vmatprep.mubr.msk.f32.mxu0 (!%p159_p10), %vm561_vm0, %v562_v6  ;;  %p184_p11 = scmp.lt.s32.totalorder (!%p159_p10), %s550_s15, 1  ;;  %v196_v8 = vld [vmem:[%s724_s1 + $0x20] sm:$0xff] (!%p159_p10)  ;;  %v197_v9 = vld [vmem:[%s724_s1 + $0x28] sm:$0xff] (!%p159_p10)  ;;  %vm207_vm1 = vcmask (!%p159_p10), 523264  }
  0x10   : > { %v414_v7 = vpack.c.bf16 (!%p159_p10), %v195_v5, %v194_v2  ;;  %v417_v10 = vpack.c.bf16 (!%p159_p10), %v197_v9, %v196_v8  ;;  %v198_v11 = vld [vmem:[%s724_s1 + $0x30] sm:$0xff] (!%p159_p10)  ;;  %v199_v12 = vld [vmem:[%s724_s1 + $0x38] sm:$0xff] (!%p159_p10)  ;;  %s181_s30 = sand.u32 (!%p159_p10), 1, %s542_s13   ;;  %v376_v15 = vld [vmem:[%s725_s2] ss:$0 sm:$0xff] (!%p159_p10)  ;;  %s379_s7 = sshll.u32 (!%p159_p10), %s550_s15, 7 }
  0x11   : > { %412 = vmatpush3.bf16.msra.mxu0 (!%p159_p10), %v411_v4  ;;  %v420_v13 = vpack.c.bf16 (!%p159_p10), %v199_v12, %v198_v11  ;;  %s374_s4 = sshll.u32 (!%p159_p10), %s181_s30, 3  ;;  %vm281_vm2 = vcmask (!%p159_p10), 261120   ;;  %s676_s18 = scalar_lea.hbm (!%p159_p10), %s726_s3, %s379_s7 }
  0x12   : > { %413 = vmatprep.subr.bf16.mxu0 (!%p159_p10), %v560_v3  ;;  %s183_s8 = scalar_lea.vmem (!%p159_p10), [#allocation2], %s374_s4  ;;  %s284_s19 = scalar_lea.sflag (!%p159_p10), [#allocation3], %s181_s30 }
  0x13   : > { %s298_s9 = sshll.u32 (!%p159_p10), %s183_s8, 4  ;;  %s678_s9 = int_to_ptr.vmem [resolvable:$true] %s298_s9 }
  0x14   : > { %s480_s21 = scalar_lea.vmem (!%p159_p10), %s678_s9, 128 }
  0x15   : > { %415 = vmatpush3.bf16.msra.mxu0 (!%p159_p10), %v414_v7  ;;  %p481_p12 = scmp.ne.s32.totalorder (!%p159_p10), %s678_s9, %s480_s21 }
  0x16   : > { %s185_s11 = scalar_select %p184_p11, %s550_s15, 1  ;;  %416 = vmatprep.subr.bf16.mxu0 %v560_v3 }
  0x17   : > { %p482_p13 = pnand %p481_p12, %p624_p4  ;;  %s563_s15 = smov [#allocation2]  }
  0x18   : > { %s375_s26 = sshll.u32 %s185_s11, 3  ;;  %s484_s23 = sshll.u32 %s563_s15, 4  ;;  %s485_s23 = int_to_ptr.vmem [resolvable:$false] %s484_s23 }
  0x19   : > { %418 = vmatpush3.bf16.msra.mxu0 %v417_v10  ;;  %s190_s29 = scalar_lea.vmem %s723_s0, %s375_s26  ;;  %p483_p0 = pneg %p482_p13 }
  0x1a   : > { %419 = vmatprep.subr.bf16.mxu0 %v560_v3  ;;  %v191_v14 = vld [vmem:[%s190_s29] sm:$0xff]  ;;  %s486_s26 = scalar_lea.vmem %s485_s23, 256  ;;  %p487_p1 = scmp.lt.s32.totalorder %s678_s9, %s485_s23 }
  0x1b   : > { %p488_p2 = scmp.lt.s32.totalorder %s486_s26, %s480_s21 }
  0x1d   : > { %421 = vmatpush3.bf16.msra.mxu0 %v420_v13  ;;  %p489_p3 = por %p488_p2, %p487_p1 }
  0x1f   : > { %p490_p5 = pnand %p489_p3, %p483_p0 }
  0x20   : > { %408 = vmatmul.mubr.msk.f32.vlgmr.msra.gmra.mrb[0].mxu0 %vm207_vm1, %v191_v14 }
  0xf3   : > { %v277_v16 = vpop.f32.mrb[0].mxu0 }
  0xf4   : > { %v278_v17 = vadd.f32 %v376_v15, %v277_v16  ;;  %v409_v18 = vpop.f32.mrb[1].mxu0 }
  0xf6   : > { %282 = vst.msk [vmem:[%s183_s8] sm:$0xff] %vm281_vm2, %v278_v17 }
  0xf7   : > { %493 = shalt.err (!%p490_p5)
}
  0xf8   : > { %s494_s27 = scalar_lea.hbm %s676_s18, 128  ;;  %s498_s30 = scalar_lea.hbm %s726_s3, 256 }
  0xf9   : > { %p495_p6 = scmp.ne.s32.totalorder %s676_s18, %s494_s27  ;;  %p499_p10 = scmp.lt.u32.totalorder %s676_s18, %s726_s3 }
  0xfa   : > { %p500_p11 = scmp.lt.u32.totalorder %s498_s30, %s494_s27  ;;  %p502_p13 = scmp.lt.u32.totalorder %s494_s27, %s676_s18 }
  0xfb   : > { %p496_p7 = pnand %p495_p6, %p624_p4 }
  0xfc   : > { %p501_p12 = por %p500_p11, %p499_p10 }
  0xfd   : > { %p497_p9 = pneg %p496_p7 }
  0xfe   : > { %p503_p0 = por %p502_p13, %p501_p12 }
 0x100   : > { %p504_p1 = pnand %p503_p0, %p497_p9 }
 0x102   : > { %507 = shalt.err (!%p504_p1)
}
 0x103   : > { %422 = dma.vmem_to_hbm [thread:$0]  (%p624_p4), %s678_s9, 128, %s676_s18, %s284_s19  }
 0x104 PF: > { %p428_p2 = scmp.ge.s32.totalorder %s558_s17, 2  ;;  %s310_s6 = sand.u32 1, %s538_s12  }
 0x105   : > { %s311_s7 = scalar_lea.sflag [#allocation3], %s310_s6 }
 0x106   : > { %p425_p3 = pnand %p428_p2, %p631_p8 }
 0x108   : > { %533 = dma.done.wait (!%p425_p3), %s311_s7, 128  }
 0x109   : > { %535 = vsyncadd (!%p425_p3), %s311_s7, 4294967168  ;;  %s16_s17 = sadd.s32 1, %s558_s17   ;;  %s729_s12 = smov %s542_s13 }
 0x10a   : > { %p13_p5 = scmp.ge.s32.totalorder %s16_s17, 4   ;;  %s730_s13 = smov %s546_s14 }
 0x10b   : > { %s731_s14 = smov %s637_s25  ;;  %s732_s15 = smov %s554_s16 }
 0x10c   : > { %s733_s16 = smov %s735_s20  ;;  %15 = sbr.rel (!%p13_p5) target bundleno = 4 (0x4), region = 67 }
 0x113   :  { %316 = vsyncpa [#allocation3], 1 }
 0x114   :  { %318 = vsyncpa [#allocation3 + $0x1], 1 }

</bundles_post_ra>
